<compile_context>
chip_gen: v6e
topology: v6e:2x2x1
jax: 0.10.0
libtpu: 0.0.40
codegen_flags: <defaults>
</compile_context>

<pallas_src>
import jax
import jax.numpy as jnp
from jax.experimental import pallas as pl
from jax.experimental.pallas import tpu as pltpu


# --------------------------------------------------------------------------
# Pallas kernel: fused spatial-channel mask apply (memory-bound streaming op)
# --------------------------------------------------------------------------
def _scrb_apply_kernel(x_ref, cm_ref, sm_ref, o_ref):
    # Native-dtype compute (masks pre-cast in the wrapper). On v5e Mosaic
    # widens bf16 VALU ops internally; no explicit upcast needed here.
    x = x_ref[...]                      # (TB, C, TN)
    cm = cm_ref[...]                    # (TB, C, 1)  -> lane broadcast over N
    sm = sm_ref[...]                    # (TB, 1, TN) -> sublane broadcast over C
    o_ref[...] = jnp.maximum(x * cm, x * sm).astype(o_ref.dtype)


# --------------------------------------------------------------------------
# Helpers
# --------------------------------------------------------------------------
def _round_up(x, m):
    return ((x + m - 1) // m) * m


def _pick_tile_n(n, cap):
    """Largest multiple of 128 that divides n and is <= cap; else full n."""
    if n % 128 != 0 or cap < 128:
        return n
    best = 128
    for mult in range(1, cap // 128 + 1):
        t = 128 * mult
        if n % t == 0:
            best = t
    return best


def _largest_divisor_leq(n, cap):
    cap = max(1, min(n, cap))
    for d in range(cap, 0, -1):
        if n % d == 0:
            return d
    return 1


def _vmem_capacity_bytes():
    try:
        return int(pltpu.get_tpu_info().vmem_capacity_bytes)
    except Exception:
        return 64 * 1024 * 1024  # conservative (v7x-sized) fallback


# --------------------------------------------------------------------------
# Wrapper: squeeze MLPs in XLA (tiny / weight-bound), fused apply in Pallas
# --------------------------------------------------------------------------
def point_scrb(points, params, *, sse_weights_bf16=None):
    """points: [B, C, N]. params: dict of weights. Returns [B, C, N]."""
    B, C, N = points.shape
    x_dtype = points.dtype
    itemsize = jnp.dtype(x_dtype).itemsize

    # ---------------- cSE mask (channel squeeze-excite) ----------------
    m = jnp.mean(points, axis=2, dtype=jnp.float32)                        # [B, C]
    h = jnp.maximum(m @ params["c_w1"].T + params["c_b1"], 0.0)            # [B, C//r]
    cmask = jax.nn.sigmoid(h @ params["c_w2"].T + params["c_b2"])          # [B, C]

    # ---------------- sSE mask (spatial squeeze-excite) ----------------
    conv_w = params["conv_w"].reshape(C).astype(x_dtype)                   # [1,C,1] -> [C]
    s = jnp.einsum("bcn,c->bn", points, conv_w,
                   preferred_element_type=jnp.float32) + params["conv_b"][0]  # [B, N]
    # At realistic N the O(N^2) FC weights dominate HBM bytes end-to-end ->
    # stream them in bf16 (f32 accumulate). Keep exact f32 at small N.
    if sse_weights_bf16 is None:
        sse_weights_bf16 = N >= 2048
    if sse_weights_bf16:
        w1 = params["s_w1"].astype(jnp.bfloat16)
        w2 = params["s_w2"].astype(jnp.bfloat16)
        hs = jnp.maximum(
            jnp.dot(s.astype(jnp.bfloat16), w1.T,
                    preferred_element_type=jnp.float32) + params["s_b1"], 0.0)
        smask = jax.nn.sigmoid(
            jnp.dot(hs.astype(jnp.bfloat16), w2.T,
                    preferred_element_type=jnp.float32) + params["s_b2"])
    else:
        hs = jnp.maximum(s @ params["s_w1"].T + params["s_b1"], 0.0)       # [B, N//r]
        smask = jax.nn.sigmoid(hs @ params["s_w2"].T + params["s_b2"])     # [B, N]

    # Layouts so the kernel broadcasts need no relayout/transposes; native
    # dtype so bf16 inputs stay bf16 in the streaming kernel.
    cmask3 = cmask.astype(x_dtype)[:, :, None]                             # [B, C, 1]
    smask3 = smask.astype(x_dtype)[:, None, :]                             # [B, 1, N]

    # ---------------- lane padding of N (lane-dense vst stores) --------
    x_in = points
    sm_in = smask3
    N_pad = N
    if N % 128 != 0 and N > 128:
        N_pad = _round_up(N, 128)
        pad = N_pad - N
        x_in = jnp.pad(points, ((0, 0), (0, 0), (0, pad)))
        sm_in = jnp.pad(smask3, ((0, 0), (0, 0), (0, pad)))

    # ---------------- tiling (dtype / padding aware) -------------------
    vmem_cap = _vmem_capacity_bytes()
    big_vmem = vmem_cap >= 100 * 1024 * 1024          # v5e / v6e (128 MiB)
    per_x_tile_budget = (20 if big_vmem else 7) * 1024 * 1024
    max_block_n = 2048 if big_vmem else 1024

    sub = max(8, 32 // itemsize)                      # sublane multiple (8 f32 / 16 bf16)
    C_pad = _round_up(C, sub)                         # sublane-padded channel axis

    TN = _pick_tile_n(N_pad, max_block_n)
    TN_acct = _round_up(TN, 128)
    tb_cap = per_x_tile_budget // max(1, C_pad * TN_acct * itemsize)
    TB = _largest_divisor_leq(B, max(1, tb_cap))      # TB bounded by VMEM, not an arbitrary cap

    # If even a single-batch tile blows the budget (huge C), shrink TN.
    while TB == 1 and C_pad * TN_acct * itemsize > per_x_tile_budget and TN % 256 == 0:
        TN //= 2
        TN_acct = _round_up(TN, 128)

    # Guarantee >= 2 grid steps so both v7x TensorCores get work.
    if (B // TB) * (N_pad // TN) < 2:
        if TN % 256 == 0:
            TN //= 2
            TN_acct = _round_up(TN, 128)
        elif TB > 1:
            TB = TB // 2 if TB % 2 == 0 else _largest_divisor_leq(B, TB - 1)

    grid = (B // TB, N_pad // TN)
    total_steps = grid[0] * grid[1]

    # ---------------- VMEM accounting & pipeline depth -----------------
    x_tile_vmem = TB * C_pad * TN_acct * itemsize
    cm_tile_vmem = TB * C_pad * 128 * itemsize        # (TB, C, 1): 1 pads to 128 lanes
    sm_tile_vmem = TB * sub * TN_acct * itemsize      # (TB, 1, TN): 1 pads to sublane mult
    mask_vmem = 2 * (cm_tile_vmem + sm_tile_vmem)     # default double-buffered

    use_buffered = (
        big_vmem
        and total_steps >= 3
        and (6 * x_tile_vmem + mask_vmem) <= int(0.65 * vmem_cap)
    )
    nbuf = 3 if use_buffered else 2
    working = 2 * nbuf * x_tile_vmem + mask_vmem      # x + out streams, plus masks
    vmem_limit = max(16 * 1024 * 1024,
                     min(working + 4 * 1024 * 1024, int(0.75 * vmem_cap)))

    x_pipe = dict(pipeline_mode=pl.Buffered(3)) if use_buffered else {}
    o_pipe = dict(pipeline_mode=pl.Buffered(3)) if use_buffered else {}

    # Grid order: n innermost so the channel-mask block index is constant
    # across the inner axis and its DMA is skipped between steps.
    out = pl.pallas_call(
        _scrb_apply_kernel,
        out_shape=jax.ShapeDtypeStruct((B, C, N_pad), x_dtype),
        grid_spec=pltpu.PrefetchScalarGridSpec(
            num_scalar_prefetch=0,
            grid=grid,
            in_specs=[
                pl.BlockSpec((TB, C, TN), lambda b, n: (b, 0, n), **x_pipe),  # points tile
                pl.BlockSpec((TB, C, 1), lambda b, n: (b, 0, 0)),             # channel mask
                pl.BlockSpec((TB, 1, TN), lambda b, n: (b, 0, n)),            # spatial mask
            ],
            out_specs=pl.BlockSpec((TB, C, TN), lambda b, n: (b, 0, n), **o_pipe),
        ),
        compiler_params=pltpu.CompilerParams(
            dimension_semantics=("parallel", "parallel"),
            vmem_limit_bytes=int(vmem_limit),
        ),
    )(x_in, cmask3, sm_in)

    if N_pad != N:
        out = out[:, :, :N]
    return out


# --------------------------------------------------------------------------
# Pure-JAX reference of the (intended) forward pass
# --------------------------------------------------------------------------
def point_scrb_ref(points, params):
    B, C, N = points.shape
    # cSE
    m = jnp.mean(points, axis=2)                                           # [B, C]
    m = jnp.maximum(m @ params["c_w1"].T + params["c_b1"], 0.0)            # [B, C//r]
    cmask = jax.nn.sigmoid(m @ params["c_w2"].T + params["c_b2"])          # [B, C]
    out_c = points * cmask[:, :, None]
    # sSE
    s = jnp.einsum("bcn,c->bn", points, params["conv_w"].reshape(C)) + params["conv_b"][0]
    s = jnp.maximum(s @ params["s_w1"].T + params["s_b1"], 0.0)
    smask = jax.nn.sigmoid(s @ params["s_w2"].T + params["s_b2"])          # [B, N]
    out_s = points * smask[:, None, :]
    return jnp.maximum(out_c, out_s)


def init_params(key, C, N, r=2):
    Cr = C // r
    Nr = int(N / r)   # matches nn.Linear(int(n_points / r)) sizing in PointSRB
    ks = jax.random.split(key, 10)
    scale = 0.1
    return {
        "c_w1": scale * jax.random.normal(ks[0], (Cr, C), jnp.float32),
        "c_b1": scale * jax.random.normal(ks[1], (Cr,), jnp.float32),
        "c_w2": scale * jax.random.normal(ks[2], (C, Cr), jnp.float32),
        "c_b2": scale * jax.random.normal(ks[3], (C,), jnp.float32),
        "conv_w": scale * jax.random.normal(ks[4], (1, C, 1), jnp.float32),
        "conv_b": scale * jax.random.normal(ks[5], (1,), jnp.float32),
        "s_w1": scale * jax.random.normal(ks[6], (Nr, N), jnp.float32),
        "s_b1": scale * jax.random.normal(ks[7], (Nr,), jnp.float32),
        "s_w2": scale * jax.random.normal(ks[8], (N, Nr), jnp.float32),
        "s_b2": scale * jax.random.normal(ks[9], (N,), jnp.float32),
    }


if __name__ == "__main__":
    B, C, N = 2, 4, 16
    key = jax.random.PRNGKey(0)
    k_x, k_p = jax.random.split(key)
    points = jax.random.normal(k_x, (B, C, N), jnp.float32)
    params = init_params(k_p, C, N, r=2)

    out = jax.jit(point_scrb)(points, params)
    out = jax.block_until_ready(out)

    ref = point_scrb_ref(points, params)
    assert out.shape == (B, C, N)
    assert jnp.allclose(out, ref, atol=1e-5, rtol=1e-5), "mismatch vs reference"

    print("KERNEL_OK")
</pallas_src>

<mosaic_0001>
module attributes {stable_mosaic.version = 11 : i64} {
  func.func @_scrb_apply_kernel(%arg0: i32, %arg1: i32, %arg2: memref<1x4x16xf32, #tpu.memory_space<vmem>>, %arg3: memref<1x4x1xf32, #tpu.memory_space<vmem>>, %arg4: memref<1x1x16xf32, #tpu.memory_space<vmem>>, %arg5: memref<1x4x16xf32, #tpu.memory_space<vmem>>) attributes {dimension_semantics = [#tpu.dimension_semantics<parallel>, #tpu.dimension_semantics<parallel>], iteration_bounds = array<i64: 2, 1>, scalar_prefetch = 0 : i64, scratch_operands = 0 : i64, tpu.core_type = #tpu.core_type<tc>, window_params = [{transform_indices = @transform_0, window_bounds = array<i64: 1, 4, 16>}, {transform_indices = @transform_1, window_bounds = array<i64: 1, 4, 1>}, {transform_indices = @transform_2, window_bounds = array<i64: 1, 1, 16>}, {transform_indices = @transform_3, window_bounds = array<i64: 1, 4, 16>}]} {
    %c0 = arith.constant 0 : index
    %c0_0 = arith.constant 0 : index
    %c0_1 = arith.constant 0 : index
    %0 = vector.load %arg2[%c0, %c0_0, %c0_1] : memref<1x4x16xf32, #tpu.memory_space<vmem>>, vector<1x4x16xf32>
    %c0_2 = arith.constant 0 : index
    %c0_3 = arith.constant 0 : index
    %c0_4 = arith.constant 0 : index
    %1 = vector.load %arg3[%c0_2, %c0_3, %c0_4] : memref<1x4x1xf32, #tpu.memory_space<vmem>>, vector<1x4x1xf32>
    %c0_5 = arith.constant 0 : index
    %c0_6 = arith.constant 0 : index
    %c0_7 = arith.constant 0 : index
    %2 = vector.load %arg4[%c0_5, %c0_6, %c0_7] : memref<1x1x16xf32, #tpu.memory_space<vmem>>, vector<1x1x16xf32>
    %3 = vector.broadcast %1 : vector<1x4x1xf32> to vector<1x4x16xf32>
    %4 = arith.mulf %0, %3 : vector<1x4x16xf32>
    %5 = vector.broadcast %2 : vector<1x1x16xf32> to vector<1x4x16xf32>
    %6 = arith.mulf %0, %5 : vector<1x4x16xf32>
    %7 = arith.maximumf %4, %6 : vector<1x4x16xf32>
    %c0_8 = arith.constant 0 : index
    %c0_9 = arith.constant 0 : index
    %c0_10 = arith.constant 0 : index
    %8 = vector.load %arg5[%c0_8, %c0_9, %c0_10] : memref<1x4x16xf32, #tpu.memory_space<vmem>>, vector<1x4x16xf32>
    tpu.vector_store %arg5[%c0_8, %c0_9, %c0_10], %7 {strides = array<i32>} : memref<1x4x16xf32, #tpu.memory_space<vmem>>, vector<1x4x16xf32>,
    return
  }
  func.func @transform_0(%arg0: i32, %arg1: i32) -> (i32, i32, i32) {
    %c0_i32 = arith.constant 0 : i32
    %c0_i32_0 = arith.constant 0 : i32
    return %arg0, %c0_i32, %arg1 : i32, i32, i32
  }
  func.func @transform_1(%arg0: i32, %arg1: i32) -> (i32, i32, i32) {
    %c0_i32 = arith.constant 0 : i32
    %c0_i32_0 = arith.constant 0 : i32
    %c0_i32_1 = arith.constant 0 : i32
    return %arg0, %c0_i32, %c0_i32_0 : i32, i32, i32
  }
  func.func @transform_2(%arg0: i32, %arg1: i32) -> (i32, i32, i32) {
    %c0_i32 = arith.constant 0 : i32
    %c0_i32_0 = arith.constant 0 : i32
    return %arg0, %c0_i32, %arg1 : i32, i32, i32
  }
  func.func @transform_3(%arg0: i32, %arg1: i32) -> (i32, i32, i32) {
    %c0_i32 = arith.constant 0 : i32
    %c0_i32_0 = arith.constant 0 : i32
    return %arg0, %c0_i32, %arg1 : i32, i32, i32
  }
}

</mosaic_0001>

<bundles_post_ra>
// kernel: point_scrb.1
= control target key start
LH: loop header
LB: loop body
LE: loop exit
PB: predicated region body
PF: predicated region fallthrough
CT: control target
= control target key end

     0   :  { %8 = vsyncpa [#allocation3], 0  ;;  %s637_s0 = inlined_call_operand.vmem [shape: f32[2,4,16], index: 0, kind: input, shape index: {}]   ;;  %s638_s1 = inlined_call_operand.vmem [shape: f32[2,4,1], index: 1, kind: input, shape index: {}]   ;;  %s639_s2 = inlined_call_operand.vmem [shape: f32[2,1,16], index: 2, kind: input, shape index: {}]   ;;  %s640_s3 = inlined_call_operand.hbm [shape: f32[2,4,16], index: 3, kind: output, shape index: {}]  }
   0x1   :  { %10 = vsyncpa [#allocation3 + $0x1], 0  ;;  %s532_s12 = smov 0   ;;  %s534_s13 = smov 0  }
   0x2   :  { %s536_s14 = smov 0   ;;  %s538_s15 = smov 0  }
   0x3   :  { %s540_s16 = smov 0   ;;  %s542_s17 = smov 0  }
   0x4 LB: > { %s362_s18 = sadd.s32 4294967295, %s508_s17   ;;  %s363_s19 = sadd.s32 4294967294, %s508_s17   ;;  %s508_s17 = sphi %s542_s17, %s16_s17   ;;  %s504_s16 = sphi %s540_s16, %s647_s16   ;;  %s500_s15 = sphi %s538_s15, %s646_s15   ;;  %s496_s14 = sphi %s536_s14, %s645_s14   ;;  %s492_s13 = sphi %s534_s13, %s644_s13   ;;  %s488_s12 = sphi %s532_s12, %s643_s12  }
   0x5   : > { %s28_s20 = sadd.s32 1, %s504_s16  ;;  %s119_s21 = sadd.s32 1, %s496_s14 }
   0x6   : > { %p30_p0 = scmp.ge.s32.totalorder %s28_s20, 2  ;;  %p129_p1 = scmp.ne.s32.totalorder %s496_s14, %s492_s13 }
   0x7   : > { %p130_p2 = scmp.eq.s32.totalorder %s362_s18, 1  ;;  %p135_p3 = scmp.ne.s32.totalorder %s492_s13, %s488_s12 }
   0x8   : > { %s649_s20 = smov (%p30_p0, %s28_s20), 0  ;;  %p136_p5 = scmp.eq.s32.totalorder %s363_s19, 1 }
   0x9   : > { %p572_p4 = por %p130_p2, %p129_p1  ;;  %s114_s23 = ssub.s32 %s504_s16, %s649_s20 }
   0xa   : > { %p366_p6 = scmp.ge.s32.totalorder %s508_s17, 1  ;;  %p117_p7 = scmp.eq.s32.totalorder %s114_s23, 0 }
   0xb   : > { %p579_p8 = por %p136_p5, %p135_p3  ;;  %p180_p9 = scmp.lt.s32.totalorder %s508_s17, 3 }
   0xc   : > { %s585_s25 = scalar_select %p117_p7, %s496_s14, %s119_s21  }
   0xd   : > { %p181_p10 = pnand %p366_p6, %p180_p9 }
   0xe   : > { %p216_p11 = scmp.lt.s32.totalorder (!%p181_p10), %s500_s15, 1  ;;  %s213_s10 = sand.u32 (!%p181_p10), 1, %s492_s13  }
   0xf   : > { %184 = sbr.rel (%p181_p10) target bundleno = 166 (0xa6), region = 32  ;;  %s367_s11 = sshll.u32 (!%p181_p10), %s213_s10, 2 }
  0x10   : > { %s372_s18 = sshll.u32 (!%p181_p10), %s500_s15, 6  ;;  %s215_s19 = scalar_lea.vmem (!%p181_p10), [#allocation2], %s367_s11 }
  0x11   : > { %s267_s21 = sshll.u32 (!%p181_p10), %s215_s19, 4  ;;  %s265_s28 = scalar_lea.hbm (!%p181_p10), %s640_s3, %s372_s18  ;;  %s268_s21 = int_to_ptr.vmem [resolvable:$true] %s267_s21 }
  0x12   : > { %s432_s29 = scalar_lea.vmem (!%p181_p10), %s268_s21, 64 }
  0x13   : > { %p433_p12 = scmp.ne.s32.totalorder (!%p181_p10), %s268_s21, %s432_s29 }
  0x14   : > { %v510_v0 = vmov 0   ;;  %s217_s26 = scalar_select %p216_p11, %s500_s15, 1  ;;  %vm250_vm0 = vcmask 125952  }
  0x15   : > { %431 = vset.pattern.permute.xlu0 %v510_v0  ;;  %p434_p13 = pnand %p433_p12, %p572_p4 }
  0x16   : > { %s368_s27 = sshll.u32 %s217_s26, 2  ;;  %s232_s30 = scalar_lea.vmem %s639_s2, %s217_s26 }
  0x17   : > { %s226_s6 = scalar_lea.vmem %s638_s1, %s368_s27  ;;  %v370_v1 = vld [vmem:[%s232_s30] ss:$0 sm:$0xff]  ;;  %s222_s9 = scalar_lea.vmem %s637_s0, %s368_s27 }
  0x18   : > { %v234_v2 = vld [vmem:[%s226_s6] sm:$0xf]  ;;  %s253_s27 = scalar_lea.sflag [#allocation3], %s213_s10  ;;  %p435_p0 = pneg %p434_p13 }
  0x19   : > { %v233_v3 = vld [vmem:[%s222_s9] sm:$0xf]  ;;  %238 = vperm.xlu0 %431, %v234_v2   ;;  %s511_s30 = smov [#allocation2]  }
  0x1a   : > { %v248_v4 = vmul.f32 %v370_v1, %v233_v3  ;;  %s436_s4 = sshll.u32 %s511_s30, 4  ;;  %s437_s4 = int_to_ptr.vmem [resolvable:$false] %s436_s4 }
  0x1b   : > { %s438_s15 = scalar_lea.vmem %s437_s4, 128  ;;  %p439_p1 = scmp.lt.s32.totalorder %s268_s21, %s437_s4 }
  0x1c   : > { %p440_p2 = scmp.lt.s32.totalorder %s438_s15, %s432_s29 }
  0x1e   : > { %p441_p3 = por %p440_p2, %p439_p1 }
  0x20   : > { %p442_p5 = pnand %p441_p3, %p435_p0 }
  0x94   : > { %v239_v5 = vpop.permute.xlu0 %238 }
  0x95   : > { %v241_v6 = vmul.f32 %v239_v5, %v233_v3 }
  0x97   : > { %v249_v7 = vmax.f32 %v241_v6, %v248_v4 }
  0x99   : > { %251 = vst.msk [vmem:[%s215_s19] sm:$0xf] %vm250_vm0, %v249_v7 }
  0x9a   : > { %445 = shalt.err (!%p442_p5)
}
  0x9b   : > { %s446_s5 = scalar_lea.hbm %s265_s28, 64  ;;  %s450_s8 = scalar_lea.hbm %s640_s3, 128 }
  0x9c   : > { %p447_p6 = scmp.ne.s32.totalorder %s265_s28, %s446_s5  ;;  %p451_p10 = scmp.lt.s32.totalorder %s265_s28, %s640_s3 }
  0x9d   : > { %p452_p11 = scmp.lt.s32.totalorder %s450_s8, %s446_s5 }
  0x9e   : > { %p448_p7 = pnand %p447_p6, %p572_p4 }
  0x9f   : > { %p453_p12 = por %p452_p11, %p451_p10 }
  0xa0   : > { %p449_p9 = pneg %p448_p7 }
  0xa2   : > { %p454_p13 = pnand %p453_p12, %p449_p9 }
  0xa4   : > { %457 = shalt.err (!%p454_p13)
}
  0xa5   : > { %375 = dma.vmem_to_hbm [thread:$0]  (%p572_p4), %s268_s21, 64, %s265_s28, %s253_s27  }
  0xa6 PF: > { %p381_p0 = scmp.ge.s32.totalorder %s508_s17, 2  ;;  %s279_s11 = sand.u32 1, %s488_s12  }
  0xa7   : > { %s280_s18 = scalar_lea.sflag [#allocation3], %s279_s11 }
  0xa8   : > { %p378_p1 = pnand %p381_p0, %p579_p8 }
  0xaa   : > { %p379_p2 = pneg %p378_p1 }
  0xac   : > { %483 = dma.done.wait (%p379_p2), %s280_s18, 64  }
  0xad   : > { %485 = vsyncadd (%p379_p2), %s280_s18, 4294967232  ;;  %s16_s17 = sadd.s32 1, %s508_s17   ;;  %s643_s12 = smov %s492_s13 }
  0xae   : > { %p13_p3 = scmp.ge.s32.totalorder %s16_s17, 4   ;;  %s644_s13 = smov %s496_s14 }
  0xaf   : > { %s645_s14 = smov %s585_s25  ;;  %s646_s15 = smov %s504_s16 }
  0xb0   : > { %s647_s16 = smov %s649_s20  ;;  %15 = sbr.rel (!%p13_p3) target bundleno = 4 (0x4), region = 73 }
  0xb5   :  { %285 = vsyncpa [#allocation3], 1 }
  0xb6   :  { %287 = vsyncpa [#allocation3 + $0x1], 1 }

</bundles_post_ra>
